<compile_context>
chip_gen: v6e
topology: v6e:2x2x1
jax: 0.10.0
libtpu: 0.0.40
codegen_flags: <defaults>
</compile_context>

<pallas_src>
import functools

import jax
import jax.numpy as jnp
from jax.experimental import pallas as pl
from jax.experimental.pallas import tpu as pltpu

_MIB = 1024 * 1024


def _pick_tile(n, block_n):
    """Largest t <= block_n with t % 128 == 0 and n % t == 0, preferring >= 2 dst tiles
    (v7x megacore).  Falls back to t == n (full-array block) if no 128-multiple divides n."""
    cands = [t for t in range(128, min(block_n, n) + 1, 128) if n % t == 0]
    if not cands:
        return n
    multi = [t for t in cands if n // t >= 2]
    return max(multi) if multi else max(cands)


# --------------------------------------------------------------------------------------
# Input prep: L2-normalized bf16 copy + raw bf16 copy of the node features.
# --------------------------------------------------------------------------------------
def _prep_kernel(x_ref, nh_ref, hb_ref):
    x = x_ref[...]
    ssq = jnp.sum(x * x, axis=-1, keepdims=True)
    nh = x * jax.lax.rsqrt(jnp.maximum(ssq, 1e-24))   # F.normalize(p=2, dim=-1)
    nh_ref[...] = nh.astype(jnp.bfloat16)
    hb_ref[...] = x.astype(jnp.bfloat16)


def _prep(x, *, block_n=512):
    N, F = x.shape
    t = _pick_tile(N, block_n)
    return pl.pallas_call(
        _prep_kernel,
        grid_spec=pltpu.PrefetchScalarGridSpec(
            num_scalar_prefetch=0, grid=(N // t,),
            in_specs=[pl.BlockSpec((t, F), lambda i: (i, 0))],
            out_specs=(pl.BlockSpec((t, F), lambda i: (i, 0)),
                       pl.BlockSpec((t, F), lambda i: (i, 0)))),
        out_shape=(jax.ShapeDtypeStruct((N, F), jnp.bfloat16),
                   jax.ShapeDtypeStruct((N, F), jnp.bfloat16)),
        compiler_params=pltpu.CompilerParams(dimension_semantics=("parallel",)),
    )(x)


# --------------------------------------------------------------------------------------
# AGNNConv: flash-style tiled kernel with fused epilogue.
#   epilogue == "feat"    -> emit normalized bf16 + raw bf16 features for the next layer
#   epilogue == "marker"  -> emit h_out @ W_sum  (MarkerWeight * + sum over marker_dim)
#   epilogue == "softmax" -> emit softmax(h_out / t1, dim=1)
# --------------------------------------------------------------------------------------
def _agnn_kernel(*refs, scale, epilogue, inv_t1):
    if epilogue == "marker":
        (nhq_ref, nhk_ref, hk_ref, adj_ref, w_ref,
         out_ref, qs_ref, m_ref, l_ref, acc_ref) = refs
    elif epilogue == "feat":
        (nhq_ref, nhk_ref, hk_ref, adj_ref,
         nh_out_ref, hb_out_ref, qs_ref, m_ref, l_ref, acc_ref) = refs
    else:  # "softmax"
        (nhq_ref, nhk_ref, hk_ref, adj_ref,
         out_ref, qs_ref, m_ref, l_ref, acc_ref) = refs

    k = pl.program_id(1)

    @pl.when(k == 0)
    def _init():
        # Fold beta/temp scale into the cached dst operand once per dst tile.
        q = nhq_ref[...].astype(jnp.float32)
        if scale != 1.0:
            q = q * scale
        qs_ref[...] = q.astype(jnp.bfloat16)
        m_ref[...] = jnp.full(m_ref.shape, -1e30, dtype=jnp.float32)
        l_ref[...] = jnp.zeros_like(l_ref)
        acc_ref[...] = jnp.zeros_like(acc_ref)

    # s[v, u] = scale * <nh_dst[v], nh_src[u]>   (bf16 operands, f32 MXU accumulation)
    s = jax.lax.dot_general(qs_ref[...], nhk_ref[...],
                            (((1,), (1,)), ((), ())),
                            preferred_element_type=jnp.float32)
    adj = adj_ref[...].astype(jnp.float32)            # exact 0/1 mask (int8 in HBM)

    # Online edge-softmax over incoming edges.  Running max over *unmasked* scores is
    # safe (|s| <= |scale|); non-edges are zeroed exactly by `* adj` below.
    m_prev = m_ref[...]
    m_new = jnp.maximum(m_prev, jnp.max(s, axis=1, keepdims=True))
    alpha = jnp.exp(m_prev - m_new)
    p = jnp.exp(s - m_new) * adj
    l_ref[...] = alpha * l_ref[...] + jnp.sum(p, axis=1, keepdims=True)
    acc_ref[...] = alpha * acc_ref[...] + jnp.dot(
        p.astype(jnp.bfloat16), hk_ref[...], preferred_element_type=jnp.float32)
    m_ref[...] = m_new

    @pl.when(k == pl.num_programs(1) - 1)
    def _finalize():
        l = l_ref[...]
        inv_l = jnp.where(l > 0, pl.reciprocal(l, approx=True), 0.0)  # 0-in-degree -> 0
        h_out = acc_ref[...] * inv_l                   # (t, F) aggregated features

        if epilogue == "feat":
            ssq = jnp.sum(h_out * h_out, axis=-1, keepdims=True)
            nh = h_out * jax.lax.rsqrt(jnp.maximum(ssq, 1e-24))
            nh_out_ref[...] = nh.astype(jnp.bfloat16)
            hb_out_ref[...] = h_out.astype(jnp.bfloat16)
        elif epilogue == "marker":
            # MarkerWeight multiply + sum over marker_dim as one small MXU matmul.
            out_ref[...] = jnp.dot(h_out, w_ref[...],
                                   preferred_element_type=jnp.float32)
        else:  # "softmax"
            o = h_out * inv_t1
            po = jnp.exp(o - jnp.max(o, axis=-1, keepdims=True))
            out_ref[...] = po / jnp.sum(po, axis=-1, keepdims=True)  # exact: rows sum to 1


def _agnn_layer(nh, hb, adj_i8, *, scale, epilogue, wsum=None, inv_t1=1.0, block_n=512):
    N, F = nh.shape
    t = _pick_tile(N, block_n)
    n_tiles = N // t

    in_specs = [
        pl.BlockSpec((t, F), lambda i, k: (i, 0)),   # normalized dst features (bf16)
        pl.BlockSpec((t, F), lambda i, k: (k, 0)),   # normalized src features (bf16)
        pl.BlockSpec((t, F), lambda i, k: (k, 0)),   # raw src features (bf16, aggregation)
        pl.BlockSpec((t, t), lambda i, k: (i, k)),   # adjacency tile (int8 0/1 mask)
    ]
    args = [nh, nh, hb, adj_i8]

    if epilogue == "marker":
        D, O = wsum.shape
        in_specs.append(pl.BlockSpec((D, O), lambda i, k: (0, 0)))
        args.append(wsum)
        out_specs = pl.BlockSpec((t, O), lambda i, k: (i, 0))
        out_shape = jax.ShapeDtypeStruct((N, O), jnp.float32)
    elif epilogue == "feat":
        out_specs = (pl.BlockSpec((t, F), lambda i, k: (i, 0)),
                     pl.BlockSpec((t, F), lambda i, k: (i, 0)))
        out_shape = (jax.ShapeDtypeStruct((N, F), jnp.bfloat16),
                     jax.ShapeDtypeStruct((N, F), jnp.bfloat16))
    else:  # "softmax"
        out_specs = pl.BlockSpec((t, F), lambda i, k: (i, 0))
        out_shape = jax.ShapeDtypeStruct((N, F), jnp.float32)

    # VMEM budget: double-buffered bf16 features + int8 adjacency, outputs, scratch and
    # the f32 (t, t) temporaries (scores / exp / adj-cast / bf16 p).  Clamped to 48 MiB
    # (<= 3/4 of v7x's 64 MiB physical VMEM); safe for block_n up to 1024.
    need = (2 * (3 * t * F * 2 + t * t)      # double-buffered inputs
            + 4 * t * F * 4                  # double-buffered outputs (upper bound)
            + t * F * 6 + 8 * t              # scratch (qs, acc, m, l)
            + 4 * t * t * 4                  # (t, t) f32/bf16 temporaries
            + 2 * _MIB)
    vmem_bytes = int(min(max(2 * need, 32 * _MIB), 48 * _MIB))

    kernel = functools.partial(_agnn_kernel, scale=float(scale),
                               epilogue=epilogue, inv_t1=float(inv_t1))

    return pl.pallas_call(
        kernel,
        grid_spec=pltpu.PrefetchScalarGridSpec(
            num_scalar_prefetch=0,
            grid=(n_tiles, n_tiles),
            in_specs=in_specs,
            out_specs=out_specs,
            scratch_shapes=[
                pltpu.VMEM((t, F), jnp.bfloat16),   # scaled normalized dst operand
                pltpu.VMEM((t, 1), jnp.float32),    # online-softmax running max
                pltpu.VMEM((t, 1), jnp.float32),    # online-softmax denominator
                pltpu.VMEM((t, F), jnp.float32),    # aggregation accumulator
            ]),
        out_shape=out_shape,
        compiler_params=pltpu.CompilerParams(
            dimension_semantics=("parallel", "arbitrary"),
            vmem_limit_bytes=vmem_bytes),
    )(*args)


# --------------------------------------------------------------------------------------
# BatchNorm1d (training-mode batch stats, gamma=1, beta=0) + LeakyReLU(0.25).
# Pass 1: tiled stats accumulation.  Pass 2: normalize + activation, also emitting the
# normalized/raw bf16 copies consumed by AGNN layer 3 (fused prep).
# --------------------------------------------------------------------------------------
def _bn_stats_kernel(x_ref, mean_ref, istd_ref, *, inv_n, eps):
    i = pl.program_id(0)

    @pl.when(i == 0)
    def _init():
        mean_ref[...] = jnp.zeros_like(mean_ref)
        istd_ref[...] = jnp.zeros_like(istd_ref)

    x = x_ref[...]
    mean_ref[...] += jnp.sum(x, axis=0, keepdims=True)       # running sum
    istd_ref[...] += jnp.sum(x * x, axis=0, keepdims=True)   # running sum of squares

    @pl.when(i == pl.num_programs(0) - 1)
    def _finalize():
        mean = mean_ref[...] * inv_n
        var = jnp.maximum(istd_ref[...] * inv_n - mean * mean, 0.0)  # biased variance
        mean_ref[...] = mean
        istd_ref[...] = jax.lax.rsqrt(var + eps)


def _bn_apply_kernel(x_ref, mean_ref, istd_ref, f_ref, nh_ref, hb_ref, *, neg_slope):
    y = (x_ref[...] - mean_ref[...]) * istd_ref[...]
    f = jnp.where(y >= 0, y, neg_slope * y)
    f_ref[...] = f
    ssq = jnp.sum(f * f, axis=-1, keepdims=True)
    nh = f * jax.lax.rsqrt(jnp.maximum(ssq, 1e-24))
    nh_ref[...] = nh.astype(jnp.bfloat16)
    hb_ref[...] = f.astype(jnp.bfloat16)


def _batchnorm_leakyrelu(x, *, eps=1e-5, neg_slope=0.25, block_n=512):
    N, C = x.shape
    t = _pick_tile(N, block_n)
    n_tiles = N // t

    mean, istd = pl.pallas_call(
        functools.partial(_bn_stats_kernel, inv_n=1.0 / N, eps=float(eps)),
        grid_spec=pltpu.PrefetchScalarGridSpec(
            num_scalar_prefetch=0, grid=(n_tiles,),
            in_specs=[pl.BlockSpec((t, C), lambda i: (i, 0))],
            out_specs=(pl.BlockSpec((1, C), lambda i: (0, 0)),
                       pl.BlockSpec((1, C), lambda i: (0, 0)))),
        out_shape=(jax.ShapeDtypeStruct((1, C), jnp.float32),
                   jax.ShapeDtypeStruct((1, C), jnp.float32)),
        compiler_params=pltpu.CompilerParams(dimension_semantics=("arbitrary",)),
    )(x)

    return pl.pallas_call(
        functools.partial(_bn_apply_kernel, neg_slope=float(neg_slope)),
        grid_spec=pltpu.PrefetchScalarGridSpec(
            num_scalar_prefetch=0, grid=(n_tiles,),
            in_specs=[pl.BlockSpec((t, C), lambda i: (i, 0)),
                      pl.BlockSpec((1, C), lambda i: (0, 0)),
                      pl.BlockSpec((1, C), lambda i: (0, 0))],
            out_specs=(pl.BlockSpec((t, C), lambda i: (i, 0)),
                       pl.BlockSpec((t, C), lambda i: (i, 0)),
                       pl.BlockSpec((t, C), lambda i: (i, 0)))),
        out_shape=(jax.ShapeDtypeStruct((N, C), jnp.float32),
                   jax.ShapeDtypeStruct((N, C), jnp.bfloat16),
                   jax.ShapeDtypeStruct((N, C), jnp.bfloat16)),
        compiler_params=pltpu.CompilerParams(dimension_semantics=("parallel",)),
    )(x, mean, istd)


# --------------------------------------------------------------------------------------
# Full forward pass: GraphClassifier_noref.forward(g, x) -> (f, out)
# --------------------------------------------------------------------------------------
def graph_classifier_noref(x, adj, marker_w, *, marker_dim, output_dim,
                           t1=1.0, temp=1.0, beta=1.0, block_n=512):
    N, D = x.shape
    assert D == marker_dim * output_dim
    x = x.astype(jnp.float32)
    adj_i8 = (adj != 0).astype(jnp.int8)              # exact 0/1 mask, 1/4 the N^2 traffic
    scale = float(beta) / float(temp)                 # folded beta / temp

    # MarkerWeight multiply + sum over marker_dim embedded as one (D, output_dim) matrix:
    # W_sum[m*O + o, o] = marker_w[m, o]
    rows = jnp.arange(D)
    cols = rows % output_dim
    wsum = jnp.zeros((D, output_dim), jnp.float32).at[rows, cols].set(
        marker_w.reshape(-1).astype(jnp.float32))

    nh0, hb0 = _prep(x, block_n=block_n)
    nh1, hb1 = _agnn_layer(nh0, hb0, adj_i8, scale=scale, epilogue="feat",
                           block_n=block_n)
    f2 = _agnn_layer(nh1, hb1, adj_i8, scale=scale, epilogue="marker", wsum=wsum,
                     block_n=block_n)
    f, nh3, hb3 = _batchnorm_leakyrelu(f2, eps=1e-5, neg_slope=0.25, block_n=block_n)
    nh4, hb4 = _agnn_layer(nh3, hb3, adj_i8, scale=scale, epilogue="feat",
                           block_n=block_n)
    out = _agnn_layer(nh4, hb4, adj_i8, scale=scale, epilogue="softmax",
                      inv_t1=1.0 / float(t1), block_n=block_n)
    return f, out


if __name__ == "__main__":
    key = jax.random.PRNGKey(0)
    N, marker_dim, output_dim = 256, 4, 8
    D = marker_dim * output_dim
    block_n = 128  # 2x2 AGNN grids at N=256: exercises online-softmax tiling + parallel dst axis

    kx, ka, kw = jax.random.split(key, 3)
    x = jax.random.normal(kx, (N, D), dtype=jnp.float32)
    # deterministic random directed graph; self-loops keep in-degrees >= 1
    adj = (jax.random.uniform(ka, (N, N)) < 0.05).astype(jnp.float32)
    adj = jnp.maximum(adj, jnp.eye(N, dtype=jnp.float32))
    # MarkerWeight parameter (module initializes to ones; use a non-trivial value here)
    marker_w = 0.5 + jax.random.uniform(kw, (marker_dim, output_dim), dtype=jnp.float32)

    f, out = graph_classifier_noref(x, adj, marker_w,
                                    marker_dim=marker_dim, output_dim=output_dim,
                                    t1=1.0, temp=1.0, beta=1.0, block_n=block_n)
    jax.block_until_ready((f, out))

    # ---- pure-JAX reference (same bf16 MXU-operand precision as the kernel) ----
    def agnn_ref(h, adj_f32, s):
        ssq = jnp.sum(h * h, axis=-1, keepdims=True)
        nh = h * jax.lax.rsqrt(jnp.maximum(ssq, 1e-24))
        nh16 = nh.astype(jnp.bfloat16)
        cos = jax.lax.dot_general(nh16, nh16, (((1,), (1,)), ((), ())),
                                  preferred_element_type=jnp.float32)
        e = jnp.where(adj_f32 > 0, cos * s, -1e30)
        m = jnp.max(e, axis=1, keepdims=True)
        p = jnp.exp(e - m) * adj_f32
        l = jnp.sum(p, axis=1, keepdims=True)
        agg = jnp.dot(p.astype(jnp.bfloat16), h.astype(jnp.bfloat16),
                      preferred_element_type=jnp.float32)
        return jnp.where(l > 0, agg / l, 0.0)

    h1r = agnn_ref(x, adj, 1.0)
    h2r = agnn_ref(h1r, adj, 1.0)
    f2r = (h2r.reshape(N, marker_dim, output_dim) * marker_w[None]).sum(axis=1)
    mean = f2r.mean(axis=0, keepdims=True)
    var = ((f2r - mean) ** 2).mean(axis=0, keepdims=True)
    f_exp = (f2r - mean) * jax.lax.rsqrt(var + 1e-5)
    f_exp = jnp.where(f_exp >= 0, f_exp, 0.25 * f_exp)
    o_ref = agnn_ref(agnn_ref(f_exp, adj, 1.0), adj, 1.0)
    out_exp = jax.nn.softmax(o_ref, axis=1)

    assert f.shape == (N, output_dim) and out.shape == (N, output_dim)
    assert bool(jnp.all(jnp.isfinite(f))) and bool(jnp.all(jnp.isfinite(out)))
    # tolerances account for approx edge-softmax reciprocals + bf16 rounding-point
    # differences between the tiled online softmax and the one-shot reference
    assert jnp.allclose(f, f_exp, atol=1e-1, rtol=1e-1), \
        f"f mismatch: max abs diff {float(jnp.max(jnp.abs(f - f_exp)))}"
    assert jnp.allclose(out, out_exp, atol=5e-2, rtol=1e-1), \
        f"out mismatch: max abs diff {float(jnp.max(jnp.abs(out - out_exp)))}"
    print("KERNEL_OK")
</pallas_src>

<mosaic_0001>
module attributes {stable_mosaic.version = 11 : i64} {
  func.func @_prep_kernel(%arg0: i32, %arg1: memref<128x32xf32, #tpu.memory_space<vmem>>, %arg2: memref<128x32xbf16, #tpu.memory_space<vmem>>, %arg3: memref<128x32xbf16, #tpu.memory_space<vmem>>) attributes {dimension_semantics = [#tpu.dimension_semantics<parallel>], iteration_bounds = array<i64: 2>, scalar_prefetch = 0 : i64, scratch_operands = 0 : i64, tpu.core_type = #tpu.core_type<tc>, window_params = [{transform_indices = @transform_0, window_bounds = array<i64: 128, 32>}, {transform_indices = @transform_1, window_bounds = array<i64: 128, 32>}, {transform_indices = @transform_2, window_bounds = array<i64: 128, 32>}]} {
    %c0 = arith.constant 0 : index
    %c0_0 = arith.constant 0 : index
    %0 = vector.load %arg1[%c0, %c0_0] : memref<128x32xf32, #tpu.memory_space<vmem>>, vector<128x32xf32>
    %1 = arith.mulf %0, %0 : vector<128x32xf32>
    %cst = arith.constant dense<0.000000e+00> : vector<128xf32>
    %2 = vector.multi_reduction <add>, %1, %cst [1] : vector<128x32xf32> to vector<128xf32>
    %3 = vector.shape_cast %2 : vector<128xf32> to vector<128x1xf32>
    %cst_1 = arith.constant 1.000000e-24 : f32
    %4 = vector.broadcast %cst_1 : f32 to vector<128x1xf32>
    %5 = arith.maximumf %3, %4 : vector<128x1xf32>
    %6 = math.rsqrt %5 : vector<128x1xf32>
    %7 = vector.broadcast %6 : vector<128x1xf32> to vector<128x32xf32>
    %8 = arith.mulf %0, %7 : vector<128x32xf32>
    %9 = arith.truncf %8 : vector<128x32xf32> to vector<128x32xbf16>
    %c0_2 = arith.constant 0 : index
    %c0_3 = arith.constant 0 : index
    %10 = vector.load %arg2[%c0_2, %c0_3] : memref<128x32xbf16, #tpu.memory_space<vmem>>, vector<128x32xbf16>
    tpu.vector_store %arg2[%c0_2, %c0_3], %9 {strides = array<i32>} : memref<128x32xbf16, #tpu.memory_space<vmem>>, vector<128x32xbf16>,
    %11 = arith.truncf %0 : vector<128x32xf32> to vector<128x32xbf16>
    %c0_4 = arith.constant 0 : index
    %c0_5 = arith.constant 0 : index
    %12 = vector.load %arg3[%c0_4, %c0_5] : memref<128x32xbf16, #tpu.memory_space<vmem>>, vector<128x32xbf16>
    tpu.vector_store %arg3[%c0_4, %c0_5], %11 {strides = array<i32>} : memref<128x32xbf16, #tpu.memory_space<vmem>>, vector<128x32xbf16>,
    return
  }
  func.func @transform_0(%arg0: i32) -> (i32, i32) {
    %c0_i32 = arith.constant 0 : i32
    %c0_i32_0 = arith.constant 0 : i32
    return %arg0, %c0_i32 : i32, i32
  }
  func.func @transform_1(%arg0: i32) -> (i32, i32) {
    %c0_i32 = arith.constant 0 : i32
    %c0_i32_0 = arith.constant 0 : i32
    return %arg0, %c0_i32 : i32, i32
  }
  func.func @transform_2(%arg0: i32) -> (i32, i32) {
    %c0_i32 = arith.constant 0 : i32
    %c0_i32_0 = arith.constant 0 : i32
    return %arg0, %c0_i32 : i32, i32
  }
}

</mosaic_0001>

<bundles_post_ra>
// kernel: tpu_custom_call.1
= control target key start
LH: loop header
LB: loop body
LE: loop exit
PB: predicated region body
PF: predicated region fallthrough
CT: control target
= control target key end

     0   :  { %s681_s9 = smov 0   ;;  %s923_s0 = inlined_call_operand.vmem [shape: f32[256,32], index: 0, kind: input, shape index: {}]   ;;  %s924_s1 = inlined_call_operand.vmem [shape: bf16[256,32], index: 1, kind: output, shape index: {0}]   ;;  %s925_s2 = inlined_call_operand.vmem [shape: bf16[256,32], index: 2, kind: output, shape index: {1}]  }
   0x1 LB: > { %s541_s10 = sadd.s32 4294967295, %s664_s9   ;;  %p545_p0 = scmp.ge.s32.totalorder %s664_s9, 1  ;;  %s664_s9 = sphi %s681_s9, %s13_s9  }
   0x2   : > { %p116_p1 = scmp.lt.s32.totalorder %s664_s9, 3 }
   0x4   : > { %p117_p2 = pnand %p545_p0, %p116_p1 }
   0x5   : > { %s546_s11 = sshll.u32 (!%p117_p2), %s541_s10, 4 }
   0x6   : > { %120 = sbr.rel (%p117_p2) target bundleno = 206 (0xce), region = 24  ;;  %p144_p3 = scmp.lt.s32.totalorder (!%p117_p2), %s546_s11, 31 }
   0xb   : > { %s927_s11 = smov (!%p144_p3, %s546_s11), 31  ;;  %vm193_vm0 = vcmask 261120   ;;  %vm354_vm1 = vcmask 257024  }
   0xc   : > { %s547_s12 = sshll.u32 %s927_s11, 3  ;;  %s549_s16 = sshll.u32 %s927_s11, 2 }
   0xd   : > { %s695_s15 = scalar_lea.vmem %s923_s0, %s547_s12  ;;  %s703_s19 = scalar_lea.vmem %s925_s2, %s549_s16 }
   0xe   : > { %v706_v0 = vld [vmem:[%s695_s15 + $0x10] sm:$0xff]  ;;  %v709_v1 = vld [vmem:[%s695_s15] sm:$0xff]  ;;  %v712_v2 = vld [vmem:[%s695_s15 + $0x18] sm:$0xff]  ;;  %s871_s22 = scalar_lea.vmem %s924_s1, %s549_s16 }
   0xf   : > { %v179_v3 = vmul.f32 %v706_v0, %v706_v0  ;;  %v604_v4 = vpack.c.bf16 %v706_v0, %v706_v0  ;;  %v177_v5 = vmul.f32 %v709_v1, %v709_v1  ;;  %v602_v6 = vpack.c.bf16 %v709_v1, %v709_v1  ;;  %v723_v7 = vld [vmem:[%s695_s15 + $0x8] sm:$0xff]  ;;  %v737_v13 = vld [vmem:[%s695_s15 + $0x20] sm:$0xff]  ;;  %v756_v19 = vld [vmem:[%s695_s15 + $0x38] sm:$0xff] }
  0x10   : > { %v726_v8 = vld [vmem:[%s695_s15 + $0x28] sm:$0xff]  ;;  %v180_v9 = vmul.f32 %v712_v2, %v712_v2  ;;  %v605_v10 = vpack.c.bf16 %v712_v2, %v712_v2  ;;  %v178_v11 = vmul.f32 %v723_v7, %v723_v7  ;;  %v603_v12 = vpack.c.bf16 %v723_v7, %v723_v7  ;;  %v767_v24 = vld [vmem:[%s695_s15 + $0x30] sm:$0xff]  ;;  %v779_v28 = vld [vmem:[%s695_s15 + $0x40] sm:$0xff] }
  0x11   : > { %v200_v14 = vsel %vm193_vm0, %v179_v3, 0.0  ;;  %437 = vst.msk [vmem:[%s703_s19 + $0x8] sm:$0xf] %vm354_vm1, %v604_v4  ;;  %v194_v15 = vsel %vm193_vm0, %v177_v5, 0.0  ;;  %435 = vst.msk [vmem:[%s703_s19] sm:$0xf] %vm354_vm1, %v602_v6  ;;  %v607_v16 = vpack.c.bf16 %v726_v8, %v726_v8  ;;  %v182_v17 = vmul.f32 %v726_v8, %v726_v8 }
  0x12   : > { %201 = vadd.xlane.f32.xlu1 %v200_v14  ;;  %195 = vadd.xlane.f32.xlu0 %v194_v15  ;;  %438 = vst.msk [vmem:[%s703_s19 + $0xc] sm:$0xf] %vm354_vm1, %v605_v10  ;;  %436 = vst.msk [vmem:[%s703_s19 + $0x4] sm:$0xf] %vm354_vm1, %v603_v12  ;;  %v606_v18 = vpack.c.bf16 %v737_v13, %v737_v13  ;;  %v203_v20 = vsel %vm193_vm0, %v180_v9, 0.0  ;;  %v197_v21 = vsel %vm193_vm0, %v178_v11, 0.0 }
  0x13   : > { %440 = vst.msk [vmem:[%s703_s19 + $0x14] sm:$0xf] %vm354_vm1, %v607_v16  ;;  %v181_v22 = vmul.f32 %v737_v13, %v737_v13  ;;  %v609_v23 = vpack.c.bf16 %v756_v19, %v756_v19  ;;  %v770_v25 = vld [vmem:[%s695_s15 + $0x48] sm:$0xff]  ;;  %v608_v26 = vpack.c.bf16 %v767_v24, %v767_v24  ;;  %v610_v29 = vpack.c.bf16 %v779_v28, %v779_v28  ;;  %v786_v30 = vld [vmem:[%s695_s15 + $0x58] sm:$0xff]  ;;  %v798_v34 = vld [vmem:[%s695_s15 + $0x50] sm:$0xff] }
  0x14   : > { %439 = vst.msk [vmem:[%s703_s19 + $0x10] sm:$0xf] %vm354_vm1, %v606_v18  ;;  %v611_v27 = vpack.c.bf16 %v770_v25, %v770_v25  ;;  %v209_v31 = vsel %vm193_vm0, %v182_v17, 0.0  ;;  %v184_v32 = vmul.f32 %v756_v19, %v756_v19  ;;  %v613_v33 = vpack.c.bf16 %v786_v30, %v786_v30  ;;  %v801_v35 = vld [vmem:[%s695_s15 + $0x68] sm:$0xff]  ;;  %v813_v40 = vld [vmem:[%s695_s15 + $0x60] sm:$0xff]  ;;  %v820_v42 = vld [vmem:[%s695_s15 + $0x78] sm:$0xff] }
  0x15   : > { %442 = vst.msk [vmem:[%s703_s19 + $0x1c] sm:$0xf] %vm354_vm1, %v609_v23  ;;  %441 = vst.msk [vmem:[%s703_s19 + $0x18] sm:$0xf] %vm354_vm1, %v608_v26  ;;  %v206_v36 = vsel %vm193_vm0, %v181_v22, 0.0  ;;  %v183_v37 = vmul.f32 %v767_v24, %v767_v24  ;;  %v612_v38 = vpack.c.bf16 %v798_v34, %v798_v34  ;;  %v615_v39 = vpack.c.bf16 %v801_v35, %v801_v35  ;;  %v829_v44 = vld [vmem:[%s695_s15 + $0x70] sm:$0xff] }
  0x16   : > { %204 = vadd.xlane.f32.xlu1 %v203_v20  ;;  %198 = vadd.xlane.f32.xlu0 %v197_v21  ;;  %444 = vst.msk [vmem:[%s703_s19 + $0x24] sm:$0xf] %vm354_vm1, %v611_v27  ;;  %443 = vst.msk [vmem:[%s703_s19 + $0x20] sm:$0xf] %vm354_vm1, %v610_v29  ;;  %v614_v41 = vpack.c.bf16 %v813_v40, %v813_v40  ;;  %v617_v43 = vpack.c.bf16 %v820_v42, %v820_v42  ;;  %v215_v46 = vsel %vm193_vm0, %v184_v32, 0.0 }
  0x17   : > { %446 = vst.msk [vmem:[%s703_s19 + $0x2c] sm:$0xf] %vm354_vm1, %v613_v33  ;;  %445 = vst.msk [vmem:[%s703_s19 + $0x28] sm:$0xf] %vm354_vm1, %v612_v38  ;;  %v616_v45 = vpack.c.bf16 %v829_v44, %v829_v44  ;;  %v212_v47 = vsel %vm193_vm0, %v183_v37, 0.0  ;;  %v186_v48 = vmul.f32 %v770_v25, %v770_v25  ;;  %v185_v49 = vmul.f32 %v779_v28, %v779_v28 }
  0x18   : > { %448 = vst.msk [vmem:[%s703_s19 + $0x34] sm:$0xf] %vm354_vm1, %v615_v39  ;;  %447 = vst.msk [vmem:[%s703_s19 + $0x30] sm:$0xf] %vm354_vm1, %v614_v41  ;;  %v188_v52 = vmul.f32 %v786_v30, %v786_v30  ;;  %v187_v53 = vmul.f32 %v798_v34, %v798_v34  ;;  %v190_v56 = vmul.f32 %v801_v35, %v801_v35 }
  0x19   : > { %450 = vst.msk [vmem:[%s703_s19 + $0x3c] sm:$0xf] %vm354_vm1, %v617_v43  ;;  %449 = vst.msk [vmem:[%s703_s19 + $0x38] sm:$0xf] %vm354_vm1, %v616_v45  ;;  %v221_v50 = vsel %vm193_vm0, %v186_v48, 0.0  ;;  %v218_v51 = vsel %vm193_vm0, %v185_v49, 0.0  ;;  %v189_v57 = vmul.f32 %v813_v40, %v813_v40  ;;  %v192_v60 = vmul.f32 %v820_v42, %v820_v42 }
  0x1a   : > { %210 = vadd.xlane.f32.xlu1 %v209_v31  ;;  %207 = vadd.xlane.f32.xlu0 %v206_v36  ;;  %v227_v54 = vsel %vm193_vm0, %v188_v52, 0.0  ;;  %v224_v55 = vsel %vm193_vm0, %v187_v53, 0.0  ;;  %v233_v58 = vsel %vm193_vm0, %v190_v56, 0.0  ;;  %v191_v61 = vmul.f32 %v829_v44, %v829_v44 }
  0x1b   : > { %v230_v59 = vsel %vm193_vm0, %v189_v57, 0.0  ;;  %v239_v62 = vsel %vm193_vm0, %v192_v60, 0.0 }
  0x1c   : > { %v236_v63 = vsel %vm193_vm0, %v191_v61, 0.0 }
  0x1e   : > { %216 = vadd.xlane.f32.xlu1 %v215_v46  ;;  %213 = vadd.xlane.f32.xlu0 %v212_v47 }
  0x22   : > { %222 = vadd.xlane.f32.xlu1 %v221_v50  ;;  %219 = vadd.xlane.f32.xlu0 %v218_v51 }
  0x26   : > { %228 = vadd.xlane.f32.xlu1 %v227_v54  ;;  %225 = vadd.xlane.f32.xlu0 %v224_v55 }
  0x2a   : > { %234 = vadd.xlane.f32.xlu1 %v233_v58  ;;  %231 = vadd.xlane.f32.xlu0 %v230_v59 }
  0x2e   : > { %240 = vadd.xlane.f32.xlu1 %v239_v62  ;;  %237 = vadd.xlane.f32.xlu0 %v236_v63 }
  0x9b   : > { %v202_v3 = vpop.xlane.xlu1 %201  ;;  %v196_v4 = vpop.xlane.xlu0 %195 }
  0x9c   : > { %v244_v5 = vmax.f32 %v202_v3, 1e-24  ;;  %v242_v6 = vmax.f32 %v196_v4, 1e-24 }
  0x9e   : > { %626 = vrsqrt.f32 %v244_v5 }
  0x9f   : > { %628 = vrsqrt.f32 %v242_v6  ;;  %v205_v9 = vpop.xlane.xlu1 %204  ;;  %v199_v10 = vpop.xlane.xlu0 %198 }
  0xa0   : > { %v245_v11 = vmax.f32 %v205_v9, 1e-24  ;;  %v243_v12 = vmax.f32 %v199_v10, 1e-24 }
  0xa2   : > { %630 = vrsqrt.f32 %v245_v11 }
  0xa3   : > { %632 = vrsqrt.f32 %v243_v12  ;;  %v211_v14 = vpop.xlane.xlu1 %210  ;;  %v208_v15 = vpop.xlane.xlu0 %207 }
  0xa4   : > { %v247_v16 = vmax.f32 %v211_v14, 1e-24  ;;  %v246_v17 = vmax.f32 %v208_v15, 1e-24 }
  0xa6   : > { %634 = vrsqrt.f32 %v247_v16 }
  0xa7   : > { %636 = vrsqrt.f32 %v246_v17  ;;  %v217_v18 = vpop.xlane.xlu1 %216  ;;  %v214_v20 = vpop.xlane.xlu0 %213 }
  0xa8   : > { %v249_v21 = vmax.f32 %v217_v18, 1e-24  ;;  %v248_v22 = vmax.f32 %v214_v20, 1e-24 }
  0xaa   : > { %638 = vrsqrt.f32 %v249_v21 }
  0xab   : > { %v627_v23 = vpop.eup %626  ;;  %640 = vrsqrt.f32 %v248_v22  ;;  %v223_v26 = vpop.xlane.xlu1 %222 }
  0xac   : > { %v220_v27 = vpop.xlane.xlu0 %219  ;;  %v629_v29 = vpop.eup %628  ;;  %v276_v31 = vmul.f32 %v627_v23, %v706_v0  ;;  %v251_v32 = vmax.f32 %v223_v26, 1e-24 }
  0xad   : > { %v250_v33 = vmax.f32 %v220_v27, 1e-24  ;;  %v274_v36 = vmul.f32 %v629_v29, %v709_v1 }
  0xae   : > { %v588_v37 = vpack.c.bf16 %v276_v31, %v276_v31  ;;  %642 = vrsqrt.f32 %v251_v32 }
  0xaf   : > { %v631_v38 = vpop.eup %630  ;;  %v586_v39 = vpack.c.bf16 %v274_v36, %v274_v36  ;;  %644 = vrsqrt.f32 %v250_v33  ;;  %v229_v41 = vpop.xlane.xlu1 %228 }
  0xb0   : > { %v226_v43 = vpop.xlane.xlu0 %225  ;;  %v633_v0 = vpop.eup %632  ;;  %357 = vst.msk [vmem:[%s871_s22 + $0x8] sm:$0xf] %vm354_vm1, %v588_v37  ;;  %v277_v45 = vmul.f32 %v631_v38, %v712_v2  ;;  %v253_v46 = vmax.f32 %v229_v41, 1e-24 }
  0xb1   : > { %v252_v47 = vmax.f32 %v226_v43, 1e-24  ;;  %355 = vst.msk [vmem:[%s871_s22] sm:$0xf] %vm354_vm1, %v586_v39  ;;  %v275_v1 = vmul.f32 %v633_v0, %v723_v7 }
  0xb2   : > { %v589_v48 = vpack.c.bf16 %v277_v45, %v277_v45  ;;  %646 = vrsqrt.f32 %v253_v46 }
  0xb3   : > { %v635_v49 = vpop.eup %634  ;;  %v587_v50 = vpack.c.bf16 %v275_v1, %v275_v1  ;;  %648 = vrsqrt.f32 %v252_v47  ;;  %v235_v51 = vpop.xlane.xlu1 %234 }
  0xb4   : > { %v232_v52 = vpop.xlane.xlu0 %231  ;;  %v637_v53 = vpop.eup %636  ;;  %358 = vst.msk [vmem:[%s871_s22 + $0xc] sm:$0xf] %vm354_vm1, %v589_v48  ;;  %v279_v2 = vmul.f32 %v635_v49, %v726_v8  ;;  %v255_v54 = vmax.f32 %v235_v51, 1e-24 }
  0xb5   : > { %v254_v55 = vmax.f32 %v232_v52, 1e-24  ;;  %356 = vst.msk [vmem:[%s871_s22 + $0x4] sm:$0xf] %vm354_vm1, %v587_v50  ;;  %v278_v7 = vmul.f32 %v637_v53, %v737_v13 }
  0xb6   : > { %v591_v56 = vpack.c.bf16 %v279_v2, %v279_v2  ;;  %650 = vrsqrt.f32 %v255_v54 }
  0xb7   : > { %v639_v57 = vpop.eup %638  ;;  %v590_v58 = vpack.c.bf16 %v278_v7, %v278_v7  ;;  %652 = vrsqrt.f32 %v254_v55  ;;  %v241_v59 = vpop.xlane.xlu1 %240 }
  0xb8   : > { %v238_v60 = vpop.xlane.xlu0 %237  ;;  %v641_v61 = vpop.eup %640  ;;  %360 = vst.msk [vmem:[%s871_s22 + $0x14] sm:$0xf] %vm354_vm1, %v591_v56  ;;  %v281_v8 = vmul.f32 %v639_v57, %v756_v19  ;;  %v257_v62 = vmax.f32 %v241_v59, 1e-24 }
  0xb9   : > { %v256_v63 = vmax.f32 %v238_v60, 1e-24  ;;  %359 = vst.msk [vmem:[%s871_s22 + $0x10] sm:$0xf] %vm354_vm1, %v590_v58  ;;  %v280_v13 = vmul.f32 %v641_v61, %v767_v24 }
  0xba   : > { %v593_v3 = vpack.c.bf16 %v281_v8, %v281_v8  ;;  %654 = vrsqrt.f32 %v257_v62 }
  0xbb   : > { %v643_v4 = vpop.eup %642  ;;  %v592_v5 = vpack.c.bf16 %v280_v13, %v280_v13  ;;  %656 = vrsqrt.f32 %v256_v63 }
  0xbc   : > { %v645_v6 = vpop.eup %644  ;;  %362 = vst.msk [vmem:[%s871_s22 + $0x1c] sm:$0xf] %vm354_vm1, %v593_v3  ;;  %v283_v9 = vmul.f32 %v643_v4, %v770_v25 }
  0xbd   : > { %361 = vst.msk [vmem:[%s871_s22 + $0x18] sm:$0xf] %vm354_vm1, %v592_v5  ;;  %v282_v19 = vmul.f32 %v645_v6, %v779_v28 }
  0xbe   : > { %v595_v10 = vpack.c.bf16 %v283_v9, %v283_v9 }
  0xbf   : > { %v647_v11 = vpop.eup %646  ;;  %v594_v24 = vpack.c.bf16 %v282_v19, %v282_v19 }
  0xc0   : > { %v649_v12 = vpop.eup %648  ;;  %364 = vst.msk [vmem:[%s871_s22 + $0x24] sm:$0xf] %vm354_vm1, %v595_v10  ;;  %v285_v14 = vmul.f32 %v647_v11, %v786_v30 }
  0xc1   : > { %363 = vst.msk [vmem:[%s871_s22 + $0x20] sm:$0xf] %vm354_vm1, %v594_v24  ;;  %v284_v15 = vmul.f32 %v649_v12, %v798_v34 }
  0xc2   : > { %v597_v25 = vpack.c.bf16 %v285_v14, %v285_v14 }
  0xc3   : > { %v651_v16 = vpop.eup %650  ;;  %v596_v17 = vpack.c.bf16 %v284_v15, %v284_v15 }
  0xc4   : > { %v653_v18 = vpop.eup %652  ;;  %366 = vst.msk [vmem:[%s871_s22 + $0x2c] sm:$0xf] %vm354_vm1, %v597_v25  ;;  %v287_v28 = vmul.f32 %v651_v16, %v801_v35 }
  0xc5   : > { %365 = vst.msk [vmem:[%s871_s22 + $0x28] sm:$0xf] %vm354_vm1, %v596_v17  ;;  %v286_v20 = vmul.f32 %v653_v18, %v813_v40 }
  0xc6   : > { %v599_v30 = vpack.c.bf16 %v287_v28, %v287_v28 }
  0xc7   : > { %v655_v21 = vpop.eup %654  ;;  %v598_v22 = vpack.c.bf16 %v286_v20, %v286_v20 }
  0xc8   : > { %v657_v23 = vpop.eup %656  ;;  %368 = vst.msk [vmem:[%s871_s22 + $0x34] sm:$0xf] %vm354_vm1, %v599_v30  ;;  %v289_v34 = vmul.f32 %v655_v21, %v820_v42 }
  0xc9   : > { %367 = vst.msk [vmem:[%s871_s22 + $0x30] sm:$0xf] %vm354_vm1, %v598_v22  ;;  %v288_v26 = vmul.f32 %v657_v23, %v829_v44 }
  0xca   : > { %v601_v27 = vpack.c.bf16 %v289_v34, %v289_v34 }
  0xcb   : > { %v600_v29 = vpack.c.bf16 %v288_v26, %v288_v26 }
  0xcc   : > { %370 = vst.msk [vmem:[%s871_s22 + $0x3c] sm:$0xf] %vm354_vm1, %v601_v27 }
  0xcd   : > { %369 = vst.msk [vmem:[%s871_s22 + $0x38] sm:$0xf] %vm354_vm1, %v600_v29 }
  0xce PF: > { %s13_s9 = sadd.s32 1, %s664_s9  }
  0xcf   : > { %p10_p4 = scmp.ge.s32.totalorder %s13_s9, 4  }
  0xd1   :  { %12 = sbr.rel (!%p10_p4) target bundleno = 1 (0x1), region = 66 }

</bundles_post_ra>
